<compile_context>
chip_gen: v6e
topology: v6e:2x2x1
jax: 0.10.0
libtpu: 0.0.40
codegen_flags: <defaults>
</compile_context>

<pallas_src>
import math
from functools import partial

import jax
import jax.numpy as jnp
from jax import lax
from jax.experimental import pallas as pl
from jax.experimental.pallas import tpu as pltpu


def _pick_tile(dim, target, align):
    """Largest divisor of `dim` that is <= target and a multiple of `align`.
    Falls back to the full dim (block == full array dim is always legal)."""
    if dim <= target:
        return dim
    t = (target // align) * align
    while t >= align:
        if dim % t == 0:
            return t
        t -= align
    return dim


# ---------------------------------------------------------------------------
# Kernel 1: tiled, pipelined linear (x @ W + b) — used for QKV (fused) and fc
# ---------------------------------------------------------------------------
def _linear_kernel(x_ref, w_ref, b_ref, o_ref, acc_ref):
    @pl.when(pl.program_id(2) == 0)
    def _():
        acc_ref[...] = jnp.zeros_like(acc_ref)

    acc_ref[...] += jnp.dot(x_ref[...], w_ref[...],
                            preferred_element_type=jnp.float32)

    @pl.when(pl.program_id(2) == pl.num_programs(2) - 1)
    def _():
        o_ref[...] = (acc_ref[...] + b_ref[...]).astype(o_ref.dtype)


def linear(x, w, b, *, tm=512, tn=256, tk=512):
    M, K = x.shape
    N = w.shape[1]
    tm = _pick_tile(M, tm, 8)      # sublane-aligned
    tn = _pick_tile(N, tn, 128)    # lane-aligned (lane-dense output stores)
    tk = _pick_tile(K, tk, 128)    # lane-aligned (also sublane for w)
    grid = (M // tm, N // tn, K // tk)
    return pl.pallas_call(
        _linear_kernel,
        out_shape=jax.ShapeDtypeStruct((M, N), x.dtype),
        grid=grid,
        in_specs=[
            pl.BlockSpec((tm, tk), lambda i, j, k: (i, k)),
            pl.BlockSpec((tk, tn), lambda i, j, k: (k, j)),
            pl.BlockSpec((1, tn), lambda i, j, k: (0, j)),
        ],
        out_specs=pl.BlockSpec((tm, tn), lambda i, j, k: (i, j)),
        scratch_shapes=[pltpu.VMEM((tm, tn), jnp.float32)],
        compiler_params=pltpu.CompilerParams(
            dimension_semantics=("parallel", "parallel", "arbitrary")),
    )(x, w, b.reshape(1, N).astype(jnp.float32))


# ---------------------------------------------------------------------------
# Kernel 2: flash-style multi-head attention
#   grid = (B, Sq/tq, Sk/tk); all heads per step; lane-dense (tq, H*d_v) output
#   Q is pre-scaled by 1/sqrt(d_k) (folded into the projection weights).
# ---------------------------------------------------------------------------
def _flash_mha_kernel(q_ref, k_ref, v_ref, o_ref, m_ref, l_ref, acc_ref,
                      *, n_head, d_k, d_v):
    ki = pl.program_id(2)

    @pl.when(ki == 0)
    def _():
        m_ref[...] = jnp.full_like(m_ref, -jnp.inf)
        l_ref[...] = jnp.zeros_like(l_ref)
        acc_ref[...] = jnp.zeros_like(acc_ref)

    q = q_ref[0]  # (tq, H*d_k) — already scaled by 1/sqrt(d_k)
    k = k_ref[0]  # (tk, H*d_k)
    v = v_ref[0]  # (tk, H*d_v)

    for h in range(n_head):  # static unroll over heads
        qh = q[:, h * d_k:(h + 1) * d_k]
        kh = k[:, h * d_k:(h + 1) * d_k]
        vh = v[:, h * d_v:(h + 1) * d_v]

        # (tq, tk) scores: contract last dims directly (no .T / XLU transpose)
        s = lax.dot_general(qh, kh, (((1,), (1,)), ((), ())),
                            preferred_element_type=jnp.float32)

        m_prev = m_ref[:, h:h + 1]                                   # (tq, 1)
        m_new = jnp.maximum(m_prev, jnp.max(s, axis=-1, keepdims=True))
        alpha = jnp.exp(m_prev - m_new)
        p = jnp.exp(s - m_new)                                       # (tq, tk)

        l_ref[:, h:h + 1] = alpha * l_ref[:, h:h + 1] + jnp.sum(
            p, axis=-1, keepdims=True)
        acc_ref[:, h * d_v:(h + 1) * d_v] = (
            alpha * acc_ref[:, h * d_v:(h + 1) * d_v]
            + jnp.dot(p.astype(vh.dtype), vh,
                      preferred_element_type=jnp.float32))
        m_ref[:, h:h + 1] = m_new

    @pl.when(ki == pl.num_programs(2) - 1)
    def _():
        # normalize per head in the f32 scratch, then one lane-dense store
        for h in range(n_head):
            inv = pl.reciprocal(l_ref[:, h:h + 1], approx=True)
            acc_ref[:, h * d_v:(h + 1) * d_v] = (
                acc_ref[:, h * d_v:(h + 1) * d_v] * inv)
        o_ref[0] = acc_ref[...].astype(o_ref.dtype)


def flash_mha_attention(q, k, v, n_head, d_k, d_v, *, tq=256, tk=512):
    # q: (B, Sq, H*d_k)  k: (B, Sk, H*d_k)  v: (B, Sk, H*d_v)
    B, Sq, HDk = q.shape
    _, Sk, HDv = v.shape
    tq = _pick_tile(Sq, tq, 8)
    tk = _pick_tile(Sk, tk, 8)
    grid = (B, Sq // tq, Sk // tk)
    kernel = partial(_flash_mha_kernel, n_head=n_head, d_k=d_k, d_v=d_v)
    return pl.pallas_call(
        kernel,
        out_shape=jax.ShapeDtypeStruct((B, Sq, HDv), q.dtype),
        grid=grid,
        in_specs=[
            pl.BlockSpec((1, tq, HDk), lambda b, qi, ki: (b, qi, 0)),
            pl.BlockSpec((1, tk, HDk), lambda b, qi, ki: (b, ki, 0)),
            pl.BlockSpec((1, tk, HDv), lambda b, qi, ki: (b, ki, 0)),
        ],
        out_specs=pl.BlockSpec((1, tq, HDv), lambda b, qi, ki: (b, qi, 0)),
        scratch_shapes=[
            pltpu.VMEM((tq, n_head), jnp.float32),           # running max  m
            pltpu.VMEM((tq, n_head), jnp.float32),           # running sum  l
            pltpu.VMEM((tq, n_head * d_v), jnp.float32),     # output accum
        ],
        compiler_params=pltpu.CompilerParams(
            dimension_semantics=("parallel", "parallel", "arbitrary")),
    )(q, k, v)


# ---------------------------------------------------------------------------
# MultiHeadAttention forward (glue in plain JAX, hot paths in Pallas)
# ---------------------------------------------------------------------------
def multi_head_attention(params, query, key, value, *, compute_dtype=None):
    B, Sq, d_model = query.shape
    Sk = key.shape[1]
    H, dk, dv = params["n_head"], params["d_k"], params["d_v"]
    scale = 1.0 / math.sqrt(dk)
    dtype = compute_dtype or query.dtype  # pass jnp.bfloat16 on v6e/v7x if desired

    # Fold 1/sqrt(d_k) into the Q projection (removes the per-score VPU scale).
    w_q = params["w_qs"] * scale
    b_q = params["b_qs"] * scale

    if query is key and key is value:
        # Self-attention: fused QKV projection — activation is read once.
        w_qkv = jnp.concatenate([w_q, params["w_ks"], params["w_vs"]], axis=1)
        b_qkv = jnp.concatenate([b_q, params["b_ks"], params["b_vs"]], axis=0)
        qkv = linear(query.reshape(B * Sq, d_model).astype(dtype),
                     w_qkv.astype(dtype), b_qkv)
        q = qkv[:, :H * dk].reshape(B, Sq, H * dk)
        k = qkv[:, H * dk:2 * H * dk].reshape(B, Sk, H * dk)
        v = qkv[:, 2 * H * dk:].reshape(B, Sk, H * dv)
    else:
        # Cross-attention: separate projections (inputs differ).
        q = linear(query.reshape(B * Sq, d_model).astype(dtype),
                   w_q.astype(dtype), b_q).reshape(B, Sq, H * dk)
        k = linear(key.reshape(B * Sk, d_model).astype(dtype),
                   params["w_ks"].astype(dtype),
                   params["b_ks"]).reshape(B, Sk, H * dk)
        v = linear(value.reshape(B * Sk, d_model).astype(dtype),
                   params["w_vs"].astype(dtype),
                   params["b_vs"]).reshape(B, Sk, H * dv)

    # Head split/merge happens inside the kernel (static last-dim slicing)
    # — no host-side (B,S,H,d)->(B,H,S,d) transposes bouncing through HBM.
    ctx = flash_mha_attention(q, k, v, H, dk, dv)  # (B, Sq, H*dv)

    out = linear(ctx.reshape(B * Sq, H * dv),
                 params["w_fc"].astype(dtype), params["b_fc"])
    return out.reshape(B, Sq, d_model).astype(query.dtype)


# ---------------------------------------------------------------------------
# Deterministic parameter init (shapes follow the module __init__)
# ---------------------------------------------------------------------------
def init_params(key, d_model, n_head, d_k, d_v):
    ks = jax.random.split(key, 8)

    def u(k, shape, fan_in):
        bound = 1.0 / math.sqrt(fan_in)
        return jax.random.uniform(k, shape, jnp.float32, -bound, bound)

    return {
        "n_head": n_head, "d_k": d_k, "d_v": d_v,
        "w_qs": u(ks[0], (d_model, n_head * d_k), d_model),
        "b_qs": u(ks[1], (n_head * d_k,), d_model),
        "w_ks": u(ks[2], (d_model, n_head * d_k), d_model),
        "b_ks": u(ks[3], (n_head * d_k,), d_model),
        "w_vs": u(ks[4], (d_model, n_head * d_v), d_model),
        "b_vs": u(ks[5], (n_head * d_v,), d_model),
        "w_fc": u(ks[6], (n_head * d_v, d_model), n_head * d_v),
        "b_fc": u(ks[7], (d_model,), n_head * d_v),
    }


# Pure-JAX reference for sanity checking
def reference_mha(params, query, key, value):
    B, Sq, d_model = query.shape
    Sk = key.shape[1]
    H, dk, dv = params["n_head"], params["d_k"], params["d_v"]
    q = (query @ params["w_qs"] + params["b_qs"]).reshape(B, Sq, H, dk).transpose(0, 2, 1, 3)
    k = (key @ params["w_ks"] + params["b_ks"]).reshape(B, Sk, H, dk).transpose(0, 2, 1, 3)
    v = (value @ params["w_vs"] + params["b_vs"]).reshape(B, Sk, H, dv).transpose(0, 2, 1, 3)
    score = jnp.einsum("bhqd,bhkd->bhqk", q, k) / math.sqrt(dk)
    attn = jax.nn.softmax(score, axis=-1)
    ctx = jnp.einsum("bhqk,bhkd->bhqd", attn, v)
    ctx = ctx.transpose(0, 2, 1, 3).reshape(B, Sq, H * dv)
    return ctx @ params["w_fc"] + params["b_fc"]


if __name__ == "__main__":
    B, S, d_model, n_head, d_k, d_v = 2, 8, 32, 4, 8, 8

    root = jax.random.PRNGKey(0)
    kp, kx, kk, kv = jax.random.split(root, 4)
    params = init_params(kp, d_model, n_head, d_k, d_v)

    # Self-attention (exercises the fused-QKV projection path)
    x = jax.random.normal(kx, (B, S, d_model), jnp.float32)
    out_self = jax.block_until_ready(multi_head_attention(params, x, x, x))
    ref_self = reference_mha(params, x, x, x)
    assert out_self.shape == (B, S, d_model)
    assert jnp.allclose(out_self, ref_self, atol=2e-2, rtol=2e-2), \
        float(jnp.max(jnp.abs(out_self - ref_self)))

    # Cross-attention (separate query/key/value projections)
    key_in = jax.random.normal(kk, (B, S, d_model), jnp.float32)
    val_in = jax.random.normal(kv, (B, S, d_model), jnp.float32)
    out_x = jax.block_until_ready(multi_head_attention(params, x, key_in, val_in))
    ref_x = reference_mha(params, x, key_in, val_in)
    assert jnp.allclose(out_x, ref_x, atol=2e-2, rtol=2e-2), \
        float(jnp.max(jnp.abs(out_x - ref_x)))

    print("KERNEL_OK")
</pallas_src>

<mosaic_0001>
module attributes {stable_mosaic.version = 11 : i64} {
  func.func @_linear_kernel(%arg0: i32, %arg1: i32, %arg2: i32, %arg3: memref<16x32xf32, #tpu.memory_space<vmem>>, %arg4: memref<32x96xf32, #tpu.memory_space<vmem>>, %arg5: memref<1x96xf32, #tpu.memory_space<vmem>>, %arg6: memref<16x96xf32, #tpu.memory_space<vmem>>, %arg7: memref<16x96xf32, #tpu.memory_space<vmem>>) attributes {dimension_semantics = [#tpu.dimension_semantics<parallel>, #tpu.dimension_semantics<parallel>, #tpu.dimension_semantics<arbitrary>], iteration_bounds = array<i64: 1, 1, 1>, scalar_prefetch = 0 : i64, scratch_operands = 1 : i64, tpu.core_type = #tpu.core_type<tc>, window_params = [{transform_indices = @transform_0, window_bounds = array<i64: 16, 32>}, {transform_indices = @transform_1, window_bounds = array<i64: 32, 96>}, {transform_indices = @transform_2, window_bounds = array<i64: 1, 96>}, {transform_indices = @transform_3, window_bounds = array<i64: 16, 96>}]} {
    %c0_i32 = arith.constant 0 : i32
    %0 = arith.cmpi eq, %arg2, %c0_i32 : i32
    %1 = arith.extui %0 : i1 to i32
    %c0_i32_0 = arith.constant 0 : i32
    %2 = arith.cmpi ne, %1, %c0_i32_0 : i32
    scf.if %2 {
      %cst_10 = arith.constant 0.000000e+00 : f32
      %12 = vector.broadcast %cst_10 : f32 to vector<16x96xf32>
      %c0_11 = arith.constant 0 : index
      %c0_12 = arith.constant 0 : index
      %13 = vector.load %arg7[%c0_11, %c0_12] : memref<16x96xf32, #tpu.memory_space<vmem>>, vector<16x96xf32>
      tpu.vector_store %arg7[%c0_11, %c0_12], %12 {strides = array<i32>} : memref<16x96xf32, #tpu.memory_space<vmem>>, vector<16x96xf32>,
    } else {
    }
    %c0 = arith.constant 0 : index
    %c0_1 = arith.constant 0 : index
    %3 = vector.load %arg7[%c0, %c0_1] : memref<16x96xf32, #tpu.memory_space<vmem>>, vector<16x96xf32>
    %c0_2 = arith.constant 0 : index
    %c0_3 = arith.constant 0 : index
    %4 = vector.load %arg3[%c0_2, %c0_3] : memref<16x32xf32, #tpu.memory_space<vmem>>, vector<16x32xf32>
    %c0_4 = arith.constant 0 : index
    %c0_5 = arith.constant 0 : index
    %5 = vector.load %arg4[%c0_4, %c0_5] : memref<32x96xf32, #tpu.memory_space<vmem>>, vector<32x96xf32>
    %cst = arith.constant dense<0.000000e+00> : vector<16x96xf32>
    %6 = tpu.matmul %4, %5, %cst {dimension_numbers = #tpu.dot_dimension_numbers<[1], [0], [0], [1], [0, 0, 1, 1], [], []>} : vector<16x32xf32>, vector<32x96xf32>, vector<16x96xf32> -> vector<16x96xf32>
    %7 = arith.addf %3, %6 : vector<16x96xf32>
    %c0_6 = arith.constant 0 : index
    %c0_7 = arith.constant 0 : index
    %8 = vector.load %arg7[%c0_6, %c0_7] : memref<16x96xf32, #tpu.memory_space<vmem>>, vector<16x96xf32>
    tpu.vector_store %arg7[%c0_6, %c0_7], %7 {strides = array<i32>} : memref<16x96xf32, #tpu.memory_space<vmem>>, vector<16x96xf32>,
    %c0_i32_8 = arith.constant 0 : i32
    %9 = arith.cmpi eq, %arg2, %c0_i32_8 : i32
    %10 = arith.extui %9 : i1 to i32
    %c0_i32_9 = arith.constant 0 : i32
    %11 = arith.cmpi ne, %10, %c0_i32_9 : i32
    scf.if %11 {
      %c0_10 = arith.constant 0 : index
      %c0_11 = arith.constant 0 : index
      %12 = vector.load %arg7[%c0_10, %c0_11] : memref<16x96xf32, #tpu.memory_space<vmem>>, vector<16x96xf32>
      %c0_12 = arith.constant 0 : index
      %c0_13 = arith.constant 0 : index
      %13 = vector.load %arg5[%c0_12, %c0_13] : memref<1x96xf32, #tpu.memory_space<vmem>>, vector<1x96xf32>
      %14 = vector.broadcast %13 : vector<1x96xf32> to vector<16x96xf32>
      %15 = arith.addf %12, %14 : vector<16x96xf32>
      %c0_14 = arith.constant 0 : index
      %c0_15 = arith.constant 0 : index
      %16 = vector.load %arg6[%c0_14, %c0_15] : memref<16x96xf32, #tpu.memory_space<vmem>>, vector<16x96xf32>
      tpu.vector_store %arg6[%c0_14, %c0_15], %15 {strides = array<i32>} : memref<16x96xf32, #tpu.memory_space<vmem>>, vector<16x96xf32>,
    } else {
    }
    return
  }
  func.func @transform_0(%arg0: i32, %arg1: i32, %arg2: i32) -> (i32, i32) {
    %c0_i32 = arith.constant 0 : i32
    return %arg0, %arg2 : i32, i32
  }
  func.func @transform_1(%arg0: i32, %arg1: i32, %arg2: i32) -> (i32, i32) {
    %c0_i32 = arith.constant 0 : i32
    return %arg2, %arg1 : i32, i32
  }
  func.func @transform_2(%arg0: i32, %arg1: i32, %arg2: i32) -> (i32, i32) {
    %c0_i32 = arith.constant 0 : i32
    %c0_i32_0 = arith.constant 0 : i32
    return %c0_i32, %arg1 : i32, i32
  }
  func.func @transform_3(%arg0: i32, %arg1: i32, %arg2: i32) -> (i32, i32) {
    %c0_i32 = arith.constant 0 : i32
    return %arg0, %arg1 : i32, i32
  }
}

</mosaic_0001>

<bundles_post_ra>
// kernel: tpu_custom_call.1
= control target key start
LH: loop header
LB: loop body
LE: loop exit
PB: predicated region body
PF: predicated region fallthrough
CT: control target
= control target key end

     0   :  { %8 = vsyncpa [#allocation4], 0  ;;  %s326_s0 = inlined_call_operand.hbm [shape: f32[16,32], index: 0, kind: input, shape index: {}]   ;;  %s327_s1 = inlined_call_operand.hbm [shape: f32[32,96], index: 1, kind: input, shape index: {}]   ;;  %s328_s2 = inlined_call_operand.vmem [shape: f32[1,96], index: 2, kind: input, shape index: {}]   ;;  %s329_s3 = inlined_call_operand.hbm [shape: f32[16,96], index: 3, kind: output, shape index: {}]  }
   0x1   :  { %9 = vsyncpa [#allocation7], 0 }
   0x2   :  { %10 = vsyncpa [#allocation5], 0  ;;  %s271_s12 = smov [#allocation3]  }
   0x3   :  { %s16_s13 = sshll.u32 %s271_s12, 4  ;;  %s17_s13 = int_to_ptr.vmem [resolvable:$true] %s16_s13 }
   0x4   :  { %s213_s14 = scalar_lea.vmem %s17_s13, 256  ;;  %p218_p1 = scmp.lt.s32.totalorder %s17_s13, %s17_s13 }
   0x5   :  { %p214_p0 = scmp.ne.s32.totalorder %s17_s13, %s213_s14  ;;  %p219_p2 = scmp.lt.s32.totalorder %s213_s14, %s213_s14 }
   0x7   :  { %p220_p3 = por %p219_p2, %p218_p1 }
   0x9   :  { %p221_p4 = pnand %p220_p3, %p214_p0 }
   0xb   :  { %224 = shalt.err (!%p221_p4)
}
   0xc   :  { %s272_s15 = smov 128   ;;  %s273_s16 = smov 8  }
   0xd   :  { %22 = dma.hbm_to_vmem [thread:$0]  %s326_s0, 256, %s17_s13, [#allocation4], %s272_s15, %s272_s15, %s273_s16  }
   0xe   :  { %s274_s19 = smov [#allocation6]  }
   0xf   :  { %s28_s20 = sshll.u32 %s274_s19, 4  ;;  %s29_s20 = int_to_ptr.vmem [resolvable:$true] %s28_s20 }
  0x10   :  { %s233_s21 = scalar_lea.vmem %s29_s20, 512  ;;  %p238_p6 = scmp.lt.s32.totalorder %s29_s20, %s29_s20 }
  0x11   :  { %p234_p5 = scmp.ne.s32.totalorder %s29_s20, %s233_s21  ;;  %p239_p7 = scmp.lt.s32.totalorder %s233_s21, %s233_s21 }
  0x13   :  { %p240_p8 = por %p239_p7, %p238_p6 }
  0x15   :  { %p241_p9 = pnand %p240_p8, %p234_p5 }
  0x17   :  { %244 = shalt.err (!%p241_p9)
}
  0x18   :  { %34 = dma.hbm_to_vmem [thread:$0]  %s327_s1, 512, %s29_s20, [#allocation7], %s272_s15, %s272_s15, %s273_s16  }
  0x19   :  { %265 = dma.done.wait [#allocation4], 256  }
  0x1a   :  { %266 = vsyncadd [#allocation4], 4294967040 }
  0x1b   :  { %267 = dma.done.wait [#allocation7], 512  }
  0x1c   :  { %268 = vsyncadd [#allocation7], 4294966784  ;;  %vm47_vm0 = vcmask 785408   ;;  %v275_v0 = vmov 0.0   ;;  %vm58_vm1 = vcmask 261120   ;;  %v57_v1 = vld [vmem:[#allocation6 + $0x18] sm:$0xff] }
  0x1d   :  { %49 = vst.msk [vmem:[#allocation2 + $0x8] sm:$0xff] %vm47_vm0, %v275_v0  ;;  %48 = vst.msk [vmem:[#allocation2] sm:$0xff] %vm47_vm0, %v275_v0  ;;  %v56_v2 = vld [vmem:[#allocation6 + $0x10] sm:$0xff]  ;;  %188 = vmatprep.subr.mxu0 %v57_v1  ;;  %v55_v4 = vld [vmem:[#allocation6 + $0x8] sm:$0xff]  ;;  %s276_s24 = smov [#allocation8]  }
  0x1e   :  { %v52_v3 = vld [vmem:[#allocation3] sm:$0xff]  ;;  %189 = vmatpush3.msra.mxu0 %v57_v1  ;;  %v54_v5 = vld [vmem:[#allocation6] sm:$0xff]  ;;  %v53_v6 = vld [vmem:[#allocation3 + $0x8] sm:$0xff]  ;;  %s166_s25 = sshll.u32 %s276_s24, 4  ;;  %s167_s25 = int_to_ptr.vmem [resolvable:$true] %s166_s25 }
  0x1f   :  { %196 = vmatprep.mubr.msk.f32.mxu0 %vm58_vm1, %v52_v3  ;;  %190 = vmatprep.subr.mxu0 %v56_v2  ;;  %v181_v13 = vld [vmem:[%s328_s2] ss:$0 sm:$0xff]  ;;  %s245_s26 = scalar_lea.vmem %s167_s25, 256  ;;  %p250_p11 = scmp.lt.s32.totalorder %s167_s25, %s167_s25 }
  0x20   :  { %191 = vmatpush3.msra.mxu0 %v56_v2  ;;  %p246_p10 = scmp.ne.s32.totalorder %s167_s25, %s245_s26  ;;  %p251_p12 = scmp.lt.s32.totalorder %s245_s26, %s245_s26 }
  0x21   :  { %192 = vmatprep.subr.mxu0 %v55_v4 }
  0x22   :  { %193 = vmatpush3.msra.mxu0 %v55_v4  ;;  %p252_p13 = por %p251_p12, %p250_p11 }
  0x23   :  { %194 = vmatprep.subr.mxu0 %v54_v5 }
  0x24   :  { %195 = vmatpush3.msra.mxu0 %v54_v5  ;;  %v51_v7 = vld [vmem:[#allocation2 + $0x8] sm:$0xff]  ;;  %v50_v9 = vld [vmem:[#allocation2] sm:$0xff]  ;;  %p253_p0 = pnand %p252_p13, %p246_p10 }
  0x25   :  { %197 = vmatmul.mubr.msk.f32.vlgmr.msra.gmra.mxu0 %vm58_vm1, %v53_v6 }
  0xe5   :  { %v198_v8 = vpop.f32.mrf.mxu0 }
  0xe6   :  { %v141_v10 = vadd.f32 %v198_v8, %v51_v7 }
  0xe7   :  { %v131_v11 = vpop.f32.mrf.mxu0 }
  0xe8   :  { %144 = vst.msk [vmem:[#allocation2 + $0x8] sm:$0xff] %vm47_vm0, %v141_v10  ;;  %v140_v12 = vadd.f32 %v131_v11, %v50_v9 }
  0xea   :  { %143 = vst.msk [vmem:[#allocation2] sm:$0xff] %vm47_vm0, %v140_v12 }
  0xef   :  { %v149_v14 = vld [vmem:[#allocation2 + $0x8] sm:$0xff] }
  0xf0   :  { %v158_v15 = vadd.f32 %v181_v13, %v149_v14 }
  0xf1   :  { %v148_v16 = vld [vmem:[#allocation2] sm:$0xff] }
  0xf2   :  { %v157_v17 = vadd.f32 %v181_v13, %v148_v16  ;;  %160 = vst.msk [vmem:[#allocation8 + $0x8] sm:$0xff] %vm47_vm0, %v158_v15 }
  0xf4   :  { %159 = vst.msk [vmem:[#allocation8] sm:$0xff] %vm47_vm0, %v157_v17 }
  0xf5   :  { %256 = shalt.err (!%p253_p0)
}
  0xf6   :  { %172 = dma.vmem_to_hbm [thread:$0]  %s167_s25, 256, %s329_s3, [#allocation5], %s272_s15, %s272_s15, %s273_s16  }
  0xf7   :  { %269 = dma.done.wait [#allocation5], 256  }
  0xf8   :  { %270 = vsyncadd [#allocation5], 4294967040 }
  0xf9   :  { %176 = vsyncpa [#allocation4], 1 }
  0xfa   :  { %177 = vsyncpa [#allocation7], 1 }
  0xfb   :  { %178 = vsyncpa [#allocation5], 1 }

</bundles_post_ra>
